<compile_context>
chip_gen: v7x
topology: tpu7x:2x2x1
jax: 0.10.0
libtpu: 0.0.40
codegen_flags: <defaults>
</compile_context>

<pallas_src>
import math
import functools

import jax
import jax.numpy as jnp
from jax.experimental import pallas as pl
from jax.experimental.pallas import tpu as pltpu


def _self_attention_kernel(x_ref, win_ref, bin_ref, wout_ref, bout_ref,
                           o_ref,
                           *, n_heads: int, d_head: int, d_embed: int,
                           seq_len: int, block_b: int):
    """Fused self-attention for a block of `block_b` batch elements.

    x_ref    : (block_b, S, E)  input activations (bf16 or f32)
    win_ref  : (E, 3E)          in_proj weight (pre-transposed, PyTorch W^T)
    bin_ref  : (1, 3E)          in_proj bias
    wout_ref : (E, E)           out_proj weight (pre-transposed)
    bout_ref : (1, E)           out_proj bias
    o_ref    : (block_b, S, E)  output
    """
    cdt = x_ref.dtype               # native compute dtype (no f32 up-cast)
    S, E = seq_len, d_embed
    x = x_ref[...].reshape(block_b * S, E)              # (bb*S, E)

    # in_proj on all rows of the block: native-dtype MXU operands, f32 accum.
    qkv = jnp.dot(x, win_ref[...], preferred_element_type=jnp.float32)
    qkv = qkv + bin_ref[...].astype(jnp.float32)        # (bb*S, 3E) f32

    # Fold the 1/sqrt(d_head) scale into q once (one (bb*S, E) VPU multiply).
    scale = 1.0 / math.sqrt(d_head)
    q = (qkv[:, 0 * E:1 * E] * scale).astype(cdt)       # (bb*S, E)
    k = qkv[:, 1 * E:2 * E].astype(cdt)                 # (bb*S, E)
    v = qkv[:, 2 * E:3 * E].astype(cdt)                 # (bb*S, E)

    bout_f32 = bout_ref[...].astype(jnp.float32)        # (1, E)

    # block_b and n_heads are small & static -> fully unrolled.
    for b in range(block_b):
        rlo, rhi = b * S, (b + 1) * S
        # One K transpose per batch element (hoisted out of the head loop);
        # per-head access below is a cheap sublane slice of kT_b.
        kT_b = k[rlo:rhi, :].T                          # (E, S)

        y_b = jnp.zeros((S, E), jnp.float32)            # out_proj accumulator
        for h in range(n_heads):
            lo, hi = h * d_head, (h + 1) * d_head
            qh = q[rlo:rhi, lo:hi]                      # (S, Dh)
            khT = kT_b[lo:hi, :]                        # (Dh, S) sublane slice
            vh = v[rlo:rhi, lo:hi]                      # (S, Dh)

            s = jnp.dot(qh, khT, preferred_element_type=jnp.float32)  # (S, S)
            m = jnp.max(s, axis=-1, keepdims=True)
            p = jnp.exp(s - m)
            l = jnp.sum(p, axis=-1, keepdims=True)      # (S, 1) f32

            pv = jnp.dot(p.astype(cdt), vh, preferred_element_type=jnp.float32)
            # Normalize after P@V (touches S*Dh elems, not S*S); EUP recip.
            oh = (pv * pl.reciprocal(l, approx=True)).astype(cdt)     # (S, Dh)

            # Per-head out_proj accumulation: lane-dense (S, E) result, no
            # masked 32-lane scratch stores, no (S, E) store+reload pass.
            y_b = y_b + jnp.dot(oh, wout_ref[lo:hi, :],
                                preferred_element_type=jnp.float32)

        o_ref[b] = (y_b + bout_f32).astype(o_ref.dtype)


def self_attention_pallas(x, w_in_t, b_in, w_out_t, b_out, *,
                          n_heads: int, block_b: int = 1):
    """block_b=1: grid=(B,) parallel batch axis (feeds v7x's 2 TensorCores).
    block_b=B: single grid step (lowest pipeline overhead on v5e/v6e)."""
    B, S, E = x.shape
    d_head = E // n_heads
    assert B % block_b == 0

    kernel = functools.partial(
        _self_attention_kernel, n_heads=n_heads, d_head=d_head, d_embed=E,
        seq_len=S, block_b=block_b)

    return pl.pallas_call(
        kernel,
        out_shape=jax.ShapeDtypeStruct((B, S, E), x.dtype),
        grid_spec=pltpu.PrefetchScalarGridSpec(
            num_scalar_prefetch=0,
            grid=(B // block_b,),
            in_specs=[
                pl.BlockSpec((block_b, S, E), lambda i: (i, 0, 0)),  # x
                pl.BlockSpec((E, 3 * E), lambda i: (0, 0)),          # W_in^T
                pl.BlockSpec((1, 3 * E), lambda i: (0, 0)),          # b_in
                pl.BlockSpec((E, E), lambda i: (0, 0)),              # W_out^T
                pl.BlockSpec((1, E), lambda i: (0, 0)),              # b_out
            ],
            out_specs=pl.BlockSpec((block_b, S, E), lambda i: (i, 0, 0)),
        ),
        compiler_params=pltpu.CompilerParams(
            dimension_semantics=("parallel",),
            # Trivial footprint on v5e/v6e (128 MiB) and v7x (64 MiB).
            vmem_limit_bytes=32 * 1024 * 1024,
        ),
    )(x, w_in_t, b_in, w_out_t, b_out)


def self_attention_ref(x, w_in_t, b_in, w_out_t, b_out, *, n_heads: int):
    """Pure-JAX reference (intended PyTorch semantics), computed in f32."""
    B, S, E = x.shape
    d_head = E // n_heads
    x = x.astype(jnp.float32)
    w_in_t, b_in = w_in_t.astype(jnp.float32), b_in.astype(jnp.float32)
    w_out_t, b_out = w_out_t.astype(jnp.float32), b_out.astype(jnp.float32)

    qkv = x @ w_in_t + b_in                                 # (B, S, 3E)
    q, k, v = jnp.split(qkv, 3, axis=-1)

    def to_heads(t):                                        # (B, H, S, Dh)
        return t.reshape(B, S, n_heads, d_head).transpose(0, 2, 1, 3)

    q, k, v = to_heads(q), to_heads(k), to_heads(v)
    w = jnp.einsum("bhqd,bhkd->bhqk", q, k) / math.sqrt(d_head)
    w = jax.nn.softmax(w, axis=-1)
    o = jnp.einsum("bhqk,bhkd->bhqd", w, v)
    o = o.transpose(0, 2, 1, 3).reshape(B, S, E)
    return o @ w_out_t + b_out


if __name__ == "__main__":
    # Small shapes consistent with the module's forward; E = 128 keeps the
    # output block lane-dense, d_head = 32 keeps head slices sublane-aligned.
    B, S, E, H = 2, 16, 128, 4

    key = jax.random.PRNGKey(0)
    kx, kw1, kb1, kw2, kb2 = jax.random.split(key, 5)

    x = jax.random.normal(kx, (B, S, E), dtype=jnp.float32)

    # PyTorch Linear parameter shapes: W (out, in), b (out,).
    lim_in = 1.0 / math.sqrt(E)
    w_in = jax.random.uniform(kw1, (3 * E, E), jnp.float32, -lim_in, lim_in)
    b_in = jax.random.uniform(kb1, (3 * E,), jnp.float32, -lim_in, lim_in)
    w_out = jax.random.uniform(kw2, (E, E), jnp.float32, -lim_in, lim_in)
    b_out = jax.random.uniform(kb2, (E,), jnp.float32, -lim_in, lim_in)

    # Pre-transpose weights to (in, out); biases as (1, out) rows for VMEM.
    w_in_t = w_in.T                      # (E, 3E)
    b_in_r = b_in.reshape(1, 3 * E)
    w_out_t = w_out.T                    # (E, E)
    b_out_r = b_out.reshape(1, E)

    ref = self_attention_ref(x, w_in_t, b_in_r, w_out_t, b_out_r, n_heads=H)

    # ---- f32, block_b=1 (parallel batch grid; v7x-friendly). ----
    out = self_attention_pallas(x, w_in_t, b_in_r, w_out_t, b_out_r,
                                n_heads=H, block_b=1)
    out = jax.block_until_ready(out)
    assert out.shape == (B, S, E)
    assert jnp.allclose(out, ref, atol=1e-2, rtol=1e-2), "f32 mismatch vs ref"

    # ---- f32, block_b=B (single grid step; v5e/v6e overhead saver). ----
    out_merged = self_attention_pallas(x, w_in_t, b_in_r, w_out_t, b_out_r,
                                       n_heads=H, block_b=B)
    out_merged = jax.block_until_ready(out_merged)
    assert jnp.allclose(out_merged, ref, atol=1e-2, rtol=1e-2), \
        "f32 (merged batch) mismatch vs ref"

    # ---- bf16 path: full-rate MXU operands with f32 accumulation. ----
    to_bf16 = lambda a: a.astype(jnp.bfloat16)
    out_bf16 = self_attention_pallas(
        to_bf16(x), to_bf16(w_in_t), to_bf16(b_in_r),
        to_bf16(w_out_t), to_bf16(b_out_r), n_heads=H, block_b=1)
    out_bf16 = jax.block_until_ready(out_bf16)
    assert out_bf16.shape == (B, S, E)
    assert bool(jnp.all(jnp.isfinite(out_bf16.astype(jnp.float32))))
    assert jnp.allclose(out_bf16.astype(jnp.float32), ref,
                        atol=5e-2, rtol=5e-2), "bf16 mismatch vs ref"

    print("KERNEL_OK")
</pallas_src>

<mosaic_0001>
module attributes {stable_mosaic.version = 11 : i64} {
  func.func @_self_attention_kernel(%arg0: i32, %arg1: memref<1x16x128xf32, #tpu.memory_space<vmem>>, %arg2: memref<128x384xf32, #tpu.memory_space<vmem>>, %arg3: memref<1x384xf32, #tpu.memory_space<vmem>>, %arg4: memref<128x128xf32, #tpu.memory_space<vmem>>, %arg5: memref<1x128xf32, #tpu.memory_space<vmem>>, %arg6: memref<1x16x128xf32, #tpu.memory_space<vmem>>) attributes {dimension_semantics = [#tpu.dimension_semantics<parallel>], iteration_bounds = array<i64: 2>, scalar_prefetch = 0 : i64, scratch_operands = 0 : i64, tpu.core_type = #tpu.core_type<tc>, window_params = [{transform_indices = @transform_0, window_bounds = array<i64: 1, 16, 128>}, {pipeline_mode = #tpu.pipeline_mode<synchronous>, transform_indices = @transform_1, window_bounds = array<i64: 128, 384>}, {pipeline_mode = #tpu.pipeline_mode<synchronous>, transform_indices = @transform_2, window_bounds = array<i64: 1, 384>}, {pipeline_mode = #tpu.pipeline_mode<synchronous>, transform_indices = @transform_3, window_bounds = array<i64: 128, 128>}, {pipeline_mode = #tpu.pipeline_mode<synchronous>, transform_indices = @transform_4, window_bounds = array<i64: 1, 128>}, {transform_indices = @transform_5, window_bounds = array<i64: 1, 16, 128>}]} {
    %c0 = arith.constant 0 : index
    %c0_0 = arith.constant 0 : index
    %c0_1 = arith.constant 0 : index
    %0 = vector.load %arg1[%c0, %c0_0, %c0_1] : memref<1x16x128xf32, #tpu.memory_space<vmem>>, vector<1x16x128xf32>
    %1 = vector.shape_cast %0 : vector<1x16x128xf32> to vector<16x128xf32>
    %c0_2 = arith.constant 0 : index
    %c0_3 = arith.constant 0 : index
    %2 = vector.load %arg2[%c0_2, %c0_3] : memref<128x384xf32, #tpu.memory_space<vmem>>, vector<128x384xf32>
    %cst = arith.constant dense<0.000000e+00> : vector<16x384xf32>
    %3 = tpu.matmul %1, %2, %cst {dimension_numbers = #tpu.dot_dimension_numbers<[1], [0], [0], [1], [0, 0, 1, 1], [], []>} : vector<16x128xf32>, vector<128x384xf32>, vector<16x384xf32> -> vector<16x384xf32>
    %c0_4 = arith.constant 0 : index
    %c0_5 = arith.constant 0 : index
    %4 = vector.load %arg3[%c0_4, %c0_5] : memref<1x384xf32, #tpu.memory_space<vmem>>, vector<1x384xf32>
    %5 = vector.broadcast %4 : vector<1x384xf32> to vector<16x384xf32>
    %6 = arith.addf %3, %5 : vector<16x384xf32>
    %7 = vector.extract_strided_slice %6 {offsets = [0, 0], sizes = [16, 128], strides = [1, 1]} : vector<16x384xf32> to vector<16x128xf32>
    %cst_6 = arith.constant 0.176776692 : f32
    %8 = vector.broadcast %cst_6 : f32 to vector<16x128xf32>
    %9 = arith.mulf %7, %8 : vector<16x128xf32>
    %10 = vector.extract_strided_slice %6 {offsets = [0, 128], sizes = [16, 128], strides = [1, 1]} : vector<16x384xf32> to vector<16x128xf32>
    %11 = vector.extract_strided_slice %6 {offsets = [0, 256], sizes = [16, 128], strides = [1, 1]} : vector<16x384xf32> to vector<16x128xf32>
    %c0_7 = arith.constant 0 : index
    %c0_8 = arith.constant 0 : index
    %12 = vector.load %arg5[%c0_7, %c0_8] : memref<1x128xf32, #tpu.memory_space<vmem>>, vector<1x128xf32>
    %13 = tpu.transpose %10, [1, 0] : vector<16x128xf32> -> vector<128x16xf32>
    %cst_9 = arith.constant 0.000000e+00 : f32
    %14 = vector.broadcast %cst_9 : f32 to vector<16x128xf32>
    %15 = vector.extract_strided_slice %9 {offsets = [0, 0], sizes = [16, 32], strides = [1, 1]} : vector<16x128xf32> to vector<16x32xf32>
    %16 = vector.extract_strided_slice %13 {offsets = [0, 0], sizes = [32, 16], strides = [1, 1]} : vector<128x16xf32> to vector<32x16xf32>
    %17 = vector.extract_strided_slice %11 {offsets = [0, 0], sizes = [16, 32], strides = [1, 1]} : vector<16x128xf32> to vector<16x32xf32>
    %cst_10 = arith.constant dense<0.000000e+00> : vector<16x16xf32>
    %18 = tpu.matmul %15, %16, %cst_10 {dimension_numbers = #tpu.dot_dimension_numbers<[1], [0], [0], [1], [0, 0, 1, 1], [], []>} : vector<16x32xf32>, vector<32x16xf32>, vector<16x16xf32> -> vector<16x16xf32>
    %cst_11 = arith.constant dense<0xFF800000> : vector<16xf32>
    %19 = vector.multi_reduction <maximumf>, %18, %cst_11 [1] : vector<16x16xf32> to vector<16xf32>
    %20 = vector.shape_cast %19 : vector<16xf32> to vector<16x1xf32>
    %21 = vector.broadcast %20 : vector<16x1xf32> to vector<16x16xf32>
    %22 = arith.subf %18, %21 : vector<16x16xf32>
    %23 = math.exp %22 : vector<16x16xf32>
    %cst_12 = arith.constant dense<0.000000e+00> : vector<16xf32>
    %24 = vector.multi_reduction <add>, %23, %cst_12 [1] : vector<16x16xf32> to vector<16xf32>
    %25 = vector.shape_cast %24 : vector<16xf32> to vector<16x1xf32>
    %cst_13 = arith.constant dense<0.000000e+00> : vector<16x32xf32>
    %26 = tpu.matmul %23, %17, %cst_13 {dimension_numbers = #tpu.dot_dimension_numbers<[1], [0], [0], [1], [0, 0, 1, 1], [], []>} : vector<16x16xf32>, vector<16x32xf32>, vector<16x32xf32> -> vector<16x32xf32>
    %27 = tpu.reciprocal %25 {approx = true} : vector<16x1xf32> -> vector<16x1xf32>
    %28 = vector.broadcast %27 : vector<16x1xf32> to vector<16x32xf32>
    %29 = arith.mulf %26, %28 : vector<16x32xf32>
    %c0_14 = arith.constant 0 : index
    %c0_15 = arith.constant 0 : index
    %30 = vector.load %arg4[%c0_14, %c0_15] : memref<128x128xf32, #tpu.memory_space<vmem>>, vector<32x128xf32>
    %cst_16 = arith.constant dense<0.000000e+00> : vector<16x128xf32>
    %31 = tpu.matmul %29, %30, %cst_16 {dimension_numbers = #tpu.dot_dimension_numbers<[1], [0], [0], [1], [0, 0, 1, 1], [], []>} : vector<16x32xf32>, vector<32x128xf32>, vector<16x128xf32> -> vector<16x128xf32>
    %32 = arith.addf %14, %31 : vector<16x128xf32>
    %33 = vector.extract_strided_slice %9 {offsets = [0, 32], sizes = [16, 32], strides = [1, 1]} : vector<16x128xf32> to vector<16x32xf32>
    %34 = vector.extract_strided_slice %13 {offsets = [32, 0], sizes = [32, 16], strides = [1, 1]} : vector<128x16xf32> to vector<32x16xf32>
    %35 = vector.extract_strided_slice %11 {offsets = [0, 32], sizes = [16, 32], strides = [1, 1]} : vector<16x128xf32> to vector<16x32xf32>
    %cst_17 = arith.constant dense<0.000000e+00> : vector<16x16xf32>
    %36 = tpu.matmul %33, %34, %cst_17 {dimension_numbers = #tpu.dot_dimension_numbers<[1], [0], [0], [1], [0, 0, 1, 1], [], []>} : vector<16x32xf32>, vector<32x16xf32>, vector<16x16xf32> -> vector<16x16xf32>
    %cst_18 = arith.constant dense<0xFF800000> : vector<16xf32>
    %37 = vector.multi_reduction <maximumf>, %36, %cst_18 [1] : vector<16x16xf32> to vector<16xf32>
    %38 = vector.shape_cast %37 : vector<16xf32> to vector<16x1xf32>
    %39 = vector.broadcast %38 : vector<16x1xf32> to vector<16x16xf32>
    %40 = arith.subf %36, %39 : vector<16x16xf32>
    %41 = math.exp %40 : vector<16x16xf32>
    %cst_19 = arith.constant dense<0.000000e+00> : vector<16xf32>
    %42 = vector.multi_reduction <add>, %41, %cst_19 [1] : vector<16x16xf32> to vector<16xf32>
    %43 = vector.shape_cast %42 : vector<16xf32> to vector<16x1xf32>
    %cst_20 = arith.constant dense<0.000000e+00> : vector<16x32xf32>
    %44 = tpu.matmul %41, %35, %cst_20 {dimension_numbers = #tpu.dot_dimension_numbers<[1], [0], [0], [1], [0, 0, 1, 1], [], []>} : vector<16x16xf32>, vector<16x32xf32>, vector<16x32xf32> -> vector<16x32xf32>
    %45 = tpu.reciprocal %43 {approx = true} : vector<16x1xf32> -> vector<16x1xf32>
    %46 = vector.broadcast %45 : vector<16x1xf32> to vector<16x32xf32>
    %47 = arith.mulf %44, %46 : vector<16x32xf32>
    %c32 = arith.constant 32 : index
    %c0_21 = arith.constant 0 : index
    %48 = vector.load %arg4[%c32, %c0_21] : memref<128x128xf32, #tpu.memory_space<vmem>>, vector<32x128xf32>
    %cst_22 = arith.constant dense<0.000000e+00> : vector<16x128xf32>
    %49 = tpu.matmul %47, %48, %cst_22 {dimension_numbers = #tpu.dot_dimension_numbers<[1], [0], [0], [1], [0, 0, 1, 1], [], []>} : vector<16x32xf32>, vector<32x128xf32>, vector<16x128xf32> -> vector<16x128xf32>
    %50 = arith.addf %32, %49 : vector<16x128xf32>
    %51 = vector.extract_strided_slice %9 {offsets = [0, 64], sizes = [16, 32], strides = [1, 1]} : vector<16x128xf32> to vector<16x32xf32>
    %52 = vector.extract_strided_slice %13 {offsets = [64, 0], sizes = [32, 16], strides = [1, 1]} : vector<128x16xf32> to vector<32x16xf32>
    %53 = vector.extract_strided_slice %11 {offsets = [0, 64], sizes = [16, 32], strides = [1, 1]} : vector<16x128xf32> to vector<16x32xf32>
    %cst_23 = arith.constant dense<0.000000e+00> : vector<16x16xf32>
    %54 = tpu.matmul %51, %52, %cst_23 {dimension_numbers = #tpu.dot_dimension_numbers<[1], [0], [0], [1], [0, 0, 1, 1], [], []>} : vector<16x32xf32>, vector<32x16xf32>, vector<16x16xf32> -> vector<16x16xf32>
    %cst_24 = arith.constant dense<0xFF800000> : vector<16xf32>
    %55 = vector.multi_reduction <maximumf>, %54, %cst_24 [1] : vector<16x16xf32> to vector<16xf32>
    %56 = vector.shape_cast %55 : vector<16xf32> to vector<16x1xf32>
    %57 = vector.broadcast %56 : vector<16x1xf32> to vector<16x16xf32>
    %58 = arith.subf %54, %57 : vector<16x16xf32>
    %59 = math.exp %58 : vector<16x16xf32>
    %cst_25 = arith.constant dense<0.000000e+00> : vector<16xf32>
    %60 = vector.multi_reduction <add>, %59, %cst_25 [1] : vector<16x16xf32> to vector<16xf32>
    %61 = vector.shape_cast %60 : vector<16xf32> to vector<16x1xf32>
    %cst_26 = arith.constant dense<0.000000e+00> : vector<16x32xf32>
    %62 = tpu.matmul %59, %53, %cst_26 {dimension_numbers = #tpu.dot_dimension_numbers<[1], [0], [0], [1], [0, 0, 1, 1], [], []>} : vector<16x16xf32>, vector<16x32xf32>, vector<16x32xf32> -> vector<16x32xf32>
    %63 = tpu.reciprocal %61 {approx = true} : vector<16x1xf32> -> vector<16x1xf32>
    %64 = vector.broadcast %63 : vector<16x1xf32> to vector<16x32xf32>
    %65 = arith.mulf %62, %64 : vector<16x32xf32>
    %c64 = arith.constant 64 : index
    %c0_27 = arith.constant 0 : index
    %66 = vector.load %arg4[%c64, %c0_27] : memref<128x128xf32, #tpu.memory_space<vmem>>, vector<32x128xf32>
    %cst_28 = arith.constant dense<0.000000e+00> : vector<16x128xf32>
    %67 = tpu.matmul %65, %66, %cst_28 {dimension_numbers = #tpu.dot_dimension_numbers<[1], [0], [0], [1], [0, 0, 1, 1], [], []>} : vector<16x32xf32>, vector<32x128xf32>, vector<16x128xf32> -> vector<16x128xf32>
    %68 = arith.addf %50, %67 : vector<16x128xf32>
    %69 = vector.extract_strided_slice %9 {offsets = [0, 96], sizes = [16, 32], strides = [1, 1]} : vector<16x128xf32> to vector<16x32xf32>
    %70 = vector.extract_strided_slice %13 {offsets = [96, 0], sizes = [32, 16], strides = [1, 1]} : vector<128x16xf32> to vector<32x16xf32>
    %71 = vector.extract_strided_slice %11 {offsets = [0, 96], sizes = [16, 32], strides = [1, 1]} : vector<16x128xf32> to vector<16x32xf32>
    %cst_29 = arith.constant dense<0.000000e+00> : vector<16x16xf32>
    %72 = tpu.matmul %69, %70, %cst_29 {dimension_numbers = #tpu.dot_dimension_numbers<[1], [0], [0], [1], [0, 0, 1, 1], [], []>} : vector<16x32xf32>, vector<32x16xf32>, vector<16x16xf32> -> vector<16x16xf32>
    %cst_30 = arith.constant dense<0xFF800000> : vector<16xf32>
    %73 = vector.multi_reduction <maximumf>, %72, %cst_30 [1] : vector<16x16xf32> to vector<16xf32>
    %74 = vector.shape_cast %73 : vector<16xf32> to vector<16x1xf32>
    %75 = vector.broadcast %74 : vector<16x1xf32> to vector<16x16xf32>
    %76 = arith.subf %72, %75 : vector<16x16xf32>
    %77 = math.exp %76 : vector<16x16xf32>
    %cst_31 = arith.constant dense<0.000000e+00> : vector<16xf32>
    %78 = vector.multi_reduction <add>, %77, %cst_31 [1] : vector<16x16xf32> to vector<16xf32>
    %79 = vector.shape_cast %78 : vector<16xf32> to vector<16x1xf32>
    %cst_32 = arith.constant dense<0.000000e+00> : vector<16x32xf32>
    %80 = tpu.matmul %77, %71, %cst_32 {dimension_numbers = #tpu.dot_dimension_numbers<[1], [0], [0], [1], [0, 0, 1, 1], [], []>} : vector<16x16xf32>, vector<16x32xf32>, vector<16x32xf32> -> vector<16x32xf32>
    %81 = tpu.reciprocal %79 {approx = true} : vector<16x1xf32> -> vector<16x1xf32>
    %82 = vector.broadcast %81 : vector<16x1xf32> to vector<16x32xf32>
    %83 = arith.mulf %80, %82 : vector<16x32xf32>
    %c96 = arith.constant 96 : index
    %c0_33 = arith.constant 0 : index
    %84 = vector.load %arg4[%c96, %c0_33] : memref<128x128xf32, #tpu.memory_space<vmem>>, vector<32x128xf32>
    %cst_34 = arith.constant dense<0.000000e+00> : vector<16x128xf32>
    %85 = tpu.matmul %83, %84, %cst_34 {dimension_numbers = #tpu.dot_dimension_numbers<[1], [0], [0], [1], [0, 0, 1, 1], [], []>} : vector<16x32xf32>, vector<32x128xf32>, vector<16x128xf32> -> vector<16x128xf32>
    %86 = arith.addf %68, %85 : vector<16x128xf32>
    %87 = vector.broadcast %12 : vector<1x128xf32> to vector<16x128xf32>
    %88 = arith.addf %86, %87 : vector<16x128xf32>
    %c0_35 = arith.constant 0 : index
    %c0_36 = arith.constant 0 : index
    %c0_37 = arith.constant 0 : index
    %89 = vector.load %arg6[%c0_35, %c0_36, %c0_37] : memref<1x16x128xf32, #tpu.memory_space<vmem>>, vector<1x16x128xf32>
    %90 = vector.shape_cast %89 : vector<1x16x128xf32> to vector<16x128xf32>
    %91 = vector.shape_cast %88 : vector<16x128xf32> to vector<1x16x128xf32>
    tpu.vector_store %arg6[%c0_35, %c0_36, %c0_37], %91 {strides = array<i32>} : memref<1x16x128xf32, #tpu.memory_space<vmem>>, vector<1x16x128xf32>,
    return
  }
  func.func @transform_0(%arg0: i32) -> (i32, i32, i32) {
    %c0_i32 = arith.constant 0 : i32
    %c0_i32_0 = arith.constant 0 : i32
    %c0_i32_1 = arith.constant 0 : i32
    return %arg0, %c0_i32, %c0_i32_0 : i32, i32, i32
  }
  func.func @transform_1(%arg0: i32) -> (i32, i32) {
    %c0_i32 = arith.constant 0 : i32
    %c0_i32_0 = arith.constant 0 : i32
    %c0_i32_1 = arith.constant 0 : i32
    return %c0_i32, %c0_i32_0 : i32, i32
  }
  func.func @transform_2(%arg0: i32) -> (i32, i32) {
    %c0_i32 = arith.constant 0 : i32
    %c0_i32_0 = arith.constant 0 : i32
    %c0_i32_1 = arith.constant 0 : i32
    return %c0_i32, %c0_i32_0 : i32, i32
  }
  func.func @transform_3(%arg0: i32) -> (i32, i32) {
    %c0_i32 = arith.constant 0 : i32
    %c0_i32_0 = arith.constant 0 : i32
    %c0_i32_1 = arith.constant 0 : i32
    return %c0_i32, %c0_i32_0 : i32, i32
  }
  func.func @transform_4(%arg0: i32) -> (i32, i32) {
    %c0_i32 = arith.constant 0 : i32
    %c0_i32_0 = arith.constant 0 : i32
    %c0_i32_1 = arith.constant 0 : i32
    return %c0_i32, %c0_i32_0 : i32, i32
  }
  func.func @transform_5(%arg0: i32) -> (i32, i32, i32) {
    %c0_i32 = arith.constant 0 : i32
    %c0_i32_0 = arith.constant 0 : i32
    %c0_i32_1 = arith.constant 0 : i32
    return %arg0, %c0_i32, %c0_i32_0 : i32, i32, i32
  }
}

</mosaic_0001>

<bundles_post_ra>
// kernel: tpu_custom_call.1
= control target key start
LH: loop header
LB: loop body
LE: loop exit
PB: predicated region body
PF: predicated region fallthrough
CT: control target
= control target key end

     0   :  { %10 = vsyncpa [#allocation3], 0  ;;  %s2867_s0 = inlined_call_operand.hbm [shape: f32[2,16,128], index: 0, kind: input, shape index: {}]   ;;  %s2868_s1 = inlined_call_operand.hbm [shape: f32[128,384], index: 1, kind: input, shape index: {}]   ;;  %s2869_s2 = inlined_call_operand.vmem [shape: f32[1,384], index: 2, kind: input, shape index: {}]   ;;  %s2870_s3 = inlined_call_operand.hbm [shape: f32[128,128], index: 3, kind: input, shape index: {}]   ;;  %s2871_s4 = inlined_call_operand.vmem [shape: f32[1,128], index: 4, kind: input, shape index: {}]   ;;  %s2872_s5 = inlined_call_operand.hbm [shape: f32[2,16,128], index: 5, kind: output, shape index: {}]  }
   0x1   :  { %12 = vsyncpa [#allocation3 + $0x1], 0 }
   0x2   :  { %13 = vsyncpa [#allocation6], 0 }
   0x3   :  { %14 = vsyncpa [#allocation4], 0 }
   0x4   :  { %16 = vsyncpa [#allocation4 + $0x1], 0  ;;  %s2493_s18 = smov 0   ;;  %s2495_s19 = smov 0  }
   0x5   :  { %s2497_s20 = smov 0   ;;  %s2499_s21 = smov 0  }
   0x6 LB: > { %s2514_s22 = sadd.s32 4294967295, %s2447_s21   ;;  %s1748_s23 = sadd.s32 4294967294, %s2447_s21   ;;  %s2447_s21 = sphi %s2499_s21, %s2894_s21   ;;  %s2443_s20 = sphi %s2497_s20, %s2893_s20   ;;  %s2439_s19 = sphi %s2495_s19, %s2892_s19   ;;  %s2435_s18 = sphi %s2493_s18, %s2891_s18  }
   0x7   : > { %p42_p0 = scmp.ne.s32.totalorder %s2439_s19, %s2435_s18  ;;  %p2873_p1 = scmp.eq.s32.totalorder %s2514_s22, 0 }
   0x8   : > { %p156_p3 = scmp.eq.s32.totalorder %s1748_s23, 1  ;;  %p1749_p5 = scmp.ge.s32.totalorder %s2447_s21, 1 }
   0x9   : > { %p2523_p4 = por %p2873_p1, %p42_p0  ;;  %p163_p7 = scmp.lt.s32.totalorder %s2447_s21, 3 }
   0xa   : > { %p2528_p6 = por %p156_p3, %p42_p0  ;;  %s2449_s27 = smov [#allocation5]  }
   0xb   : > { %s2876_s24 = scalar_select %p2523_p4, 1, 0 }
   0xc   : > { %s2877_s25 = scalar_select %p2528_p6, 1, 0 }
   0xd   : > { %p2533_p8 = pnand %p1749_p5, %p163_p7  ;;  %s175_s28 = sshll.u32 %s2449_s27, 4  ;;  %s2537_s28 = int_to_ptr.vmem [resolvable:$true] %s175_s28 }
   0xe   : > { %s2450_s30 = smov [#allocation7]   ;;  %s2291_s9 = scalar_lea.hbm %s2868_s1, 6144 }
   0xf   : > { %p2164_p9 = pneg %p2533_p8  ;;  %s191_s6 = sshll.u32 %s2450_s30, 4  ;;  %s2548_s6 = int_to_ptr.vmem [resolvable:$true] %s191_s6 }
  0x10   : > { %p2292_p12 = scmp.ne.s32.totalorder %s2868_s1, %s2291_s9  ;;  %p2298_p5 = scmp.lt.u32.totalorder %s2291_s9, %s2868_s1 }
  0x11   : > { %p2544_p11 = pnand %p2164_p9, %p2873_p1 }
  0x13   : > { %p2293_p13 = pneg %p2544_p11 }
  0x15   : > { %p2294_p0 = pnand %p2293_p13, %p2292_p12 }
  0x17   : > { %p2295_p3 = pneg %p2294_p0 }
  0x19   : > { %p2300_p7 = pnand %p2298_p5, %p2295_p3 }
  0x1b   : > { %2303 = shalt.err (!%p2300_p7)
}
  0x1c   : > { %s2304_s14 = scalar_lea.vmem %s2537_s28, 6144  ;;  %p2312_p2 = scmp.lt.s32.totalorder %s2537_s28, %s2537_s28 }
  0x1d   : > { %p2305_p9 = scmp.ne.s32.totalorder %s2537_s28, %s2304_s14  ;;  %p2313_p12 = scmp.lt.s32.totalorder %s2304_s14, %s2304_s14 }
  0x1f   : > { %p2307_p10 = pnand %p2305_p9, %p2293_p13  ;;  %p2314_p0 = por %p2313_p12, %p2312_p2 }
  0x21   : > { %p2308_p1 = pneg %p2307_p10 }
  0x23   : > { %p2315_p6 = pnand %p2314_p0, %p2308_p1 }
  0x25   : > { %2318 = shalt.err (!%p2315_p6)
}
  0x26   : > { %s2451_s15 = smov 384   ;;  %s2452_s16 = smov 24  }
  0x27   : > { %2167 = dma.hbm_to_vmem [thread:$0]  (!%p2544_p11), %s2868_s1, 6144, %s2537_s28, [#allocation6], %s2451_s15, %s2451_s15, %s2452_s16  }
  0x28   : > { %s2319_s7 = scalar_lea.hbm %s2870_s3, 2048 }
  0x29   : > { %p2320_p2 = scmp.ne.s32.totalorder %s2870_s3, %s2319_s7  ;;  %p2326_p10 = scmp.lt.u32.totalorder %s2319_s7, %s2870_s3 }
  0x2b   : > { %p2322_p1 = pnand %p2320_p2, %p2293_p13 }
  0x2d   : > { %p2323_p6 = pneg %p2322_p1 }
  0x2f   : > { %p2328_p3 = pnand %p2326_p10, %p2323_p6 }
  0x31   : > { %2331 = shalt.err (!%p2328_p3)
}
  0x32   : > { %s2332_s28 = scalar_lea.vmem %s2548_s6, 2048  ;;  %p2340_p12 = scmp.lt.s32.totalorder %s2548_s6, %s2548_s6 }
  0x33   : > { %p2333_p5 = scmp.ne.s32.totalorder %s2548_s6, %s2332_s28  ;;  %p2341_p0 = scmp.lt.s32.totalorder %s2332_s28, %s2332_s28 }
  0x35   : > { %p2335_p7 = pnand %p2333_p5, %p2293_p13  ;;  %p2342_p2 = por %p2341_p0, %p2340_p12 }
  0x37   : > { %p2336_p9 = pneg %p2335_p7 }
  0x39   : > { %p2343_p1 = pnand %p2342_p2, %p2336_p9 }
  0x3b   : > { %2346 = shalt.err (!%p2343_p1)
}
  0x3c   : > { %s2453_s12 = smov 128   ;;  %s2454_s13 = smov 8  }
  0x3d   : > { %2170 = dma.hbm_to_vmem [thread:$0]  (!%p2544_p11), %s2870_s3, 2048, %s2548_s6, [#allocation6], %s2453_s12, %s2453_s12, %s2454_s13  }
  0x3e   : > { %s2606_s16 = sadd.s32 1, %s2447_s21   ;;  %s29_s23 = sadd.s32 1, %s2443_s20 }
  0x3f   : > { %s26_s17 = ssub.s32 %s2447_s21, %s2606_s16  ;;  %p36_p6 = scmp.ne.s32.totalorder %s2443_s20, %s2439_s19 }
  0x40   : > { %p27_p13 = scmp.eq.s32.totalorder %s26_s17, 0  ;;  %p37_p10 = scmp.eq.s32.totalorder %s2447_s21, 0 }
  0x41   : > { %p2880_p5 = scmp.eq.s32.totalorder %s2514_s22, 1  ;;  %p2181_p9 = scmp.lt.s32.totalorder %s2447_s21, 2 }
  0x42   : > { %s2615_s27 = scalar_select %p27_p13, %s2443_s20, %s29_s23  }
  0x43   : > { %p38_p3 = por %p37_p10, %p36_p6  ;;  %p2619_p7 = por %p2880_p5, %p36_p6 }
  0x44   : > { %s208_s30 = sand.u32 1, %s2443_s20   ;;  %s1799_s6 = sshll.u32 %s2447_s21, 8 }
  0x45   : > { %s2881_s29 = scalar_select %p2619_p7, 1, 0 }
  0x46   : > { %s1753_s7 = sshll.u32 %s208_s30, 4  ;;  %s2629_s10 = scalar_lea.hbm %s2867_s0, %s1799_s6 }
  0x47   : > { %s212_s11 = scalar_lea.vmem [#allocation2], %s1753_s7  ;;  %p2633_p11 = pnand %p2181_p9, %p38_p3 }
  0x48   : > { %s219_s28 = sshll.u32 %s212_s11, 4  ;;  %s2637_s15 = scalar_lea.sflag [#allocation3], %s208_s30  ;;  %s2631_s28 = int_to_ptr.vmem [resolvable:$true] %s219_s28 }
  0x49   : > { %s2347_s17 = scalar_lea.hbm %s2629_s10, 256  ;;  %p2349_p0 = pneg %p2633_p11 }
  0x4a   : > { %p2348_p12 = scmp.ne.s32.totalorder %s2629_s10, %s2347_s17  ;;  %s2352_s6 = scalar_lea.hbm %s2867_s0, 512 }
  0x4b   : > { %p2353_p13 = scmp.lt.u32.totalorder %s2629_s10, %s2867_s0  ;;  %p2354_p6 = scmp.lt.u32.totalorder %s2352_s6, %s2347_s17 }
  0x4c   : > { %p2350_p2 = pnand %p2349_p0, %p2348_p12  ;;  %p2356_p3 = scmp.lt.u32.totalorder %s2347_s17, %s2629_s10 }
  0x4d   : > { %p2355_p10 = por %p2354_p6, %p2353_p13 }
  0x4e   : > { %p2351_p1 = pneg %p2350_p2 }
  0x4f   : > { %p2357_p5 = por %p2356_p3, %p2355_p10 }
  0x51   : > { %p2358_p9 = pnand %p2357_p5, %p2351_p1 }
  0x53   : > { %2361 = shalt.err (!%p2358_p9)
}
  0x54   : > { %s2362_s30 = scalar_lea.vmem %s2631_s28, 256  ;;  %s2455_s11 = smov [#allocation2]  }
  0x55   : > { %p2363_p12 = scmp.ne.s32.totalorder %s2631_s28, %s2362_s30  ;;  %s2367_s23 = sshll.u32 %s2455_s11, 4  ;;  %s2368_s23 = int_to_ptr.vmem [resolvable:$false] %s2367_s23 }
  0x56   : > { %s2369_s7 = scalar_lea.vmem %s2368_s23, 512  ;;  %p2370_p4 = scmp.lt.s32.totalorder %s2631_s28, %s2368_s23 }
  0x57   : > { %p2365_p2 = pnand %p2363_p12, %p2349_p0  ;;  %p2371_p13 = scmp.lt.s32.totalorder %s2369_s7, %s2362_s30 }
  0x59   : > { %p2366_p7 = pneg %p2365_p2  ;;  %p2372_p6 = por %p2371_p13, %p2370_p4 }
  0x5b   : > { %p2373_p10 = pnand %p2372_p6, %p2366_p7 }
  0x5d   : > { %2376 = shalt.err (!%p2373_p10)
}
  0x5e   : > { %2174 = dma.hbm_to_vmem [thread:$0]  (!%p2633_p11), %s2629_s10, 256, %s2631_s28, %s2637_s15, %s2453_s12, %s2453_s12, %s2454_s13  }
  0x5f   : > { %231 = sbr.rel (%p2533_p8) target bundleno = 2331 (0x91b), region = 40  ;;  %s2671_s17 = sand.u32 (!%p2533_p8), 1, %s2439_s19  }
  0x60   : > { %s1757_s6 = sshll.u32 (!%p2533_p8), %s2671_s17, 4  ;;  %s234_s8 = scalar_lea.sflag (!%p2533_p8), [#allocation3], %s2671_s17 }
  0x61   : > { %s2677_s14 = scalar_lea.vmem (!%p2533_p8), [#allocation2], %s1757_s6  ;;  %p2883_p4 = scmp.ne.s32.totalorder (!%p2533_p8), %s2876_s24, 0 }
  0x66   : > { %2422 = dma.done.wait (%p2883_p4), %s234_s8, 256  }
  0x67   : > { %2424 = vsyncadd (%p2883_p4), %s234_s8, 4294967040  ;;  %p2884_p7 = scmp.eq.s32.totalorder %s2514_s22, 0 }
  0x69   : > { %2426 = dma.done.wait (%p2884_p7), [#allocation6], 8192   ;;  %p2885_p8 = pmov %p2884_p7 }
  0x6a   : > { %v2456_v0 = vmov 0.0   ;;  %v275_v1 = vld [vmem:[#allocation5 + $0x8] sm:$0xff]  ;;  %v278_v2 = vld [vmem:[#allocation5 + $0x20] sm:$0xff]  ;;  %v277_v5 = vld [vmem:[#allocation5 + $0x18] sm:$0xff]  ;;  %vm494_vm0 = vcmask 261120   ;;  %s2457_s12 = smov 96  }
  0x6b   : > { %2428 = vsyncadd (%p2885_p8), [#allocation6], 4294959104  ;;  %403 = vmatprep.mubr.f32.mxu0 %v2456_v0  ;;  %v274_v3 = vld [vmem:[#allocation5] sm:$0xff]  ;;  %v2010_v4 = vpack.c.bf16 %v278_v2, %v275_v1  ;;  %v281_v6 = vld [vmem:[#allocation5 + $0x38] sm:$0xff]  ;;  %vm582_vm2 = vcmask 130048   ;;  %s2458_s13 = smov 64  }
  0x6c   : > { %v284_v7 = vld [vmem:[#allocation5 + $0x50] sm:$0xff]  ;;  %v2012_v8 = vpack.c.bf16 %v277_v5, %v274_v3  ;;  %v283_v11 = vld [vmem:[#allocation5 + $0x48] sm:$0xff]  ;;  %v290_v13 = vld [vmem:[#allocation5 + $0x80] sm:$0xff]  ;;  %s2459_s10 = smov 32   ;;  %s271_s28 = scalar_lea.vmem [#allocation8], %s1757_s6 }
  0x6d   : > { %v2014_v9 = vpack.c.bf16 %v284_v7, %v281_v6  ;;  %v280_v10 = vld [vmem:[#allocation5 + $0x30] sm:$0xff]  ;;  %v287_v12 = vld [vmem:[#allocation5 + $0x68] sm:$0xff]  ;;  %2011 = vmatprep.subr.bf16.mxu0 %v2010_v4  ;;  %v286_v16 = vld [vmem:[#allocation5 + $0x60] sm:$0xff]  ;;  %s1656_s15 = sshll.u32 %s271_s28, 4  ;;  %s1800_s11 = sshll.u32 %s2514_s22, 8  ;;  %s2818_s15 = int_to_ptr.vmem [resolvable:$true] %s1656_s15 }
  0x6e   : > { %2013 = vmatpush1.bf16.msra.mxu0 %v2012_v8  ;;  %v2016_v14 = vpack.c.bf16 %v283_v11, %v280_v10  ;;  %v2018_v15 = vpack.c.bf16 %v290_v13, %v287_v12  ;;  %v289_v17 = vld [vmem:[#allocation5 + $0x78] sm:$0xff]  ;;  %v296_v19 = vld [vmem:[#allocation5 + $0xb0] sm:$0xff]  ;;  %v295_v23 = vld [vmem:[#allocation5 + $0xa8] sm:$0xff]  ;;  %v324_v12 = vlaneseq  ;;  %s2823_s8 = scalar_lea.hbm %s2872_s5, %s1800_s11  ;;  %s1643_s6 = scalar_lea.sflag [#allocation4], %s2671_s17 }
  0x6f   : > { %2015 = vmatprep.subr.bf16.mxu0 %v2014_v9  ;;  %v293_v18 = vld [vmem:[#allocation5 + $0x98] sm:$0xff]  ;;  %v2020_v20 = vpack.c.bf16 %v289_v17, %v286_v16  ;;  %v292_v22 = vld [vmem:[#allocation5 + $0x90] sm:$0xff]  ;;  %v299_v24 = vld [vmem:[#allocation5 + $0xc8] sm:$0xff]  ;;  %p2888_p0 = scmp.ne.s32.totalorder %s2881_s29, 0  ;;  %s2460_s22 = smov [#allocation8]  }
  0x70   : > { %v2022_v21 = vpack.c.bf16 %v296_v19, %v293_v18  ;;  %v302_v25 = vld [vmem:[#allocation5 + $0xe0] sm:$0xff]  ;;  %v276_v27 = vld [vmem:[#allocation5 + $0x10] sm:$0xff]  ;;  %v279_v28 = vld [vmem:[#allocation5 + $0x28] sm:$0xff]  ;;  %v2024_v29 = vpack.c.bf16 %v295_v23, %v292_v22  ;;  %v325_v13 = vshrl.u32 %v324_v12, 7  ;;  %s2381_s24 = sshll.u32 %s2460_s22, 4  ;;  %s2382_s24 = int_to_ptr.vmem [resolvable:$false] %s2381_s24 }
  0x71   : > { %v2689_v26 = vld [vmem:[%s2677_s14] sm:$0xff]  ;;  %v2042_v31 = vpack.c.bf16 %v279_v28, %v276_v27  ;;  %v285_v33 = vld [vmem:[#allocation5 + $0x58] sm:$0xff]  ;;  %v2026_v34 = vpack.c.bf16 %v302_v25, %v299_v24  ;;  %v291_v38 = vld [vmem:[#allocation5 + $0x88] sm:$0xff]  ;;  %s2383_s26 = scalar_lea.vmem %s2382_s24, 512  ;;  %p2384_p5 = scmp.lt.s32.totalorder %s2818_s15, %s2382_s24 }
  0x72   : > { %2017 = vmatpush1.bf16.msra.mxu0 %v2016_v14  ;;  %1907 = vmatprep.mubr.f32.mxu1 %v2689_v26  ;;  %v298_v30 = vld [vmem:[#allocation5 + $0xc0] sm:$0xff]  ;;  %v301_v35 = vld [vmem:[#allocation5 + $0xd8] sm:$0xff]  ;;  %v288_v37 = vld [vmem:[#allocation5 + $0x70] sm:$0xff]  ;;  %v326_v14 = vsub.s32 0, %v325_v13  ;;  %v330_v17 = vsub.s32 1, %v325_v13  ;;  %v334_v22 = vsub.s32 2, %v325_v13 }
  0x73   : > { %2019 = vmatprep.subr.bf16.mxu0 %v2018_v15  ;;  %v282_v32 = vld [vmem:[#allocation5 + $0x40] sm:$0xff]  ;;  %v305_v39 = vld [vmem:[#allocation5 + $0xf8] sm:$0xff]  ;;  %v308_v40 = vld [vmem:[#allocation5 + $0x110] sm:$0xff]  ;;  %2043 = vmatprep.subr.bf16.mxu1 %v2042_v31  ;;  %v2028_v41 = vpack.c.bf16 %v301_v35, %v298_v30  ;;  %v2050_v43 = vpack.c.bf16 %v291_v38, %v288_v37 }
  0x74   : > { %v2046_v36 = vpack.c.bf16 %v285_v33, %v282_v32  ;;  %2045 = vmatpush3.bf16.msra.mxu1 %v2042_v31  ;;  %v304_v42 = vld [vmem:[#allocation5 + $0xf0] sm:$0xff]  ;;  %v2030_v44 = vpack.c.bf16 %v308_v40, %v305_v39  ;;  %v307_v45 = vld [vmem:[#allocation5 + $0x108] sm:$0xff]  ;;  %v294_v46 = vld [vmem:[#allocation5 + $0xa0] sm:$0xff] }
  0x75   : > { %v297_v47 = vld [vmem:[#allocation5 + $0xb8] sm:$0xff]  ;;  %v311_v48 = vld [vmem:[#allocation5 + $0x128] sm:$0xff]  ;;  %v314_v49 = vld [vmem:[#allocation5 + $0x140] sm:$0xff]  ;;  %v2032_v50 = vpack.c.bf16 %v307_v45, %v304_v42 }
  0x76   : > { %2021 = vmatpush1.bf16.msra.mxu0 %v2020_v20  ;;  %2047 = vmatprep.subr.bf16.mxu1 %v2046_v36  ;;  %v310_v51 = vld [vmem:[#allocation5 + $0x120] sm:$0xff]  ;;  %v2054_v52 = vpack.c.bf16 %v297_v47, %v294_v46  ;;  %v2034_v53 = vpack.c.bf16 %v314_v49, %v311_v48  ;;  %v313_v54 = vld [vmem:[#allocation5 + $0x138] sm:$0xff]  ;;  %v300_v55 = vld [vmem:[#allocation5 + $0xd0] sm:$0xff] }
  0x77   : > { %2023 = vmatprep.subr.bf16.mxu0 %v2022_v21  ;;  %v303_v56 = vld [vmem:[#allocation5 + $0xe8] sm:$0xff]  ;;  %v317_v57 = vld [vmem:[#allocation5 + $0x158] sm:$0xff]  ;;  %v320_v58 = vld [vmem:[#allocation5 + $0x170] sm:$0xff]  ;;  %v2036_v59 = vpack.c.bf16 %v313_v54, %v310_v51 }
  0x78   : > { %2049 = vmatpush3.bf16.msra.mxu1 %v2046_v36  ;;  %v316_v60 = vld [vmem:[#allocation5 + $0x150] sm:$0xff]  ;;  %v2058_v61 = vpack.c.bf16 %v303_v56, %v300_v55  ;;  %v2038_v62 = vpack.c.bf16 %v320_v58, %v317_v57  ;;  %v319_v63 = vld [vmem:[#allocation5 + $0x168] sm:$0xff]  ;;  %v306_v1 = vld [vmem:[#allocation5 + $0x100] sm:$0xff] }
  0x79   : > { %2051 = vmatprep.subr.bf16.mxu1 %v2050_v43  ;;  %v309_v2 = vld [vmem:[#allocation5 + $0x118] sm:$0xff]  ;;  %v2040_v3 = vpack.c.bf16 %v319_v63, %v316_v60  ;;  %v312_v5 = vld [vmem:[#allocation5 + $0x130] sm:$0xff]  ;;  %v315_v6 = vld [vmem:[#allocation5 + $0x148] sm:$0xff] }
  0x7a   : > { %2025 = vmatpush1.bf16.msra.mxu0 %v2024_v29  ;;  %v2062_v4 = vpack.c.bf16 %v309_v2, %v306_v1  ;;  %v2066_v7 = vpack.c.bf16 %v315_v6, %v312_v5  ;;  %v318_v8 = vld [vmem:[#allocation5 + $0x160] sm:$0xff]  ;;  %v321_v9 = vld [vmem:[#allocation5 + $0x178] sm:$0xff]  ;;  %vm2704_vm1 = vmpackc.low %vm494_vm0, %vm494_vm0 }
  0x7b   : > { %2027 = vmatprep.subr.bf16.mxu0 %v2026_v34  ;;  %v273_v10 = vld [vmem:[%s2677_s14 + $0x8] sm:$0xff]  ;;  %v2070_v11 = vpack.c.bf16 %v321_v9, %v318_v8  ;;  %v322_v15 = vld [vmem:[%s2869_s2] sm:$0x7]  ;;  %s2377_s14 = scalar_lea.vmem %s2818_s15, 256 }
  0x7c   : > { %2053 = vmatpush3.bf16.msra.mxu1 %v2050_v43  ;;  %v327_v16 = vrot.slane %v322_v15, %v326_v14  ;;  %v331_v20 = vrot.slane %v322_v15, %v330_v17  ;;  %v335_v28 = vrot.slane %v322_v15, %v334_v22  ;;  %p2378_p11 = scmp.ne.s32.totalorder %s2818_s15, %s2377_s14  ;;  %p2385_p9 = scmp.lt.s32.totalorder %s2383_s26, %s2377_s14 }
  0x7d   : > { %2055 = vmatprep.subr.bf16.mxu1 %v2054_v52 }
  0x7e   : > { %2029 = vmatpush1.bf16.msra.mxu0 %v2028_v41  ;;  %p2379_p1 = pnand %p2378_p11, %p2888_p0  ;;  %p2386_p12 = por %p2385_p9, %p2384_p5 }
  0x7f   : > { %2031 = vmatprep.subr.bf16.mxu0 %v2030_v44 }
  0x80   : > { %2057 = vmatpush3.bf16.msra.mxu1 %v2054_v52  ;;  %p2380_p3 = pneg %p2379_p1 }
  0x81   : > { %2059 = vmatprep.subr.bf16.mxu1 %v2058_v61 }
  0x82   : > { %2033 = vmatpush1.bf16.msra.mxu0 %v2032_v50  ;;  %p2387_p2 = pnand %p2386_p12, %p2380_p3 }
  0x83   : > { %2035 = vmatprep.subr.bf16.mxu0 %v2034_v53 }
  0x84   : > { %2061 = vmatpush3.bf16.msra.mxu1 %v2058_v61 }
  0x85   : > { %2063 = vmatprep.subr.bf16.mxu1 %v2062_v4 }
  0x86   : > { %2037 = vmatpush1.bf16.msra.mxu0 %v2036_v59 }
  0x87   : > { %2039 = vmatprep.subr.bf16.mxu0 %v2038_v62 }
  0x88   : > { %2065 = vmatpush3.bf16.msra.mxu1 %v2062_v4 }
  0x89   : > { %2067 = vmatprep.subr.bf16.mxu1 %v2066_v7 }
  0x8a   : > { %2041 = vmatpush1.bf16.msra.mxu0 %v2040_v3 }
  0x8c   : > { %2069 = vmatpush3.bf16.msra.mxu1 %v2066_v7 }
  0x8d   : > { %404 = vmatmul.mubr.f32.vlgmr.msra.gmra.mrb[0].mxu0 %v2689_v26  ;;  %2071 = vmatprep.subr.bf16.mxu1 %v2070_v11 }
  0x8e   : > { %409 = vmatprep.mubr.f32.mxu0 %v2456_v0 }
  0x90   : > { %2073 = vmatpush3.bf16.msra.mxu1 %v2070_v11 }
  0x91   : > { %410 = vmatmul.mubr.f32.gmra.mrb[2].mxu0 %v273_v10 }
  0x93   : > { %1908 = vmatmul.mubr.f32.vlgmr.msra.gmra.mrb[0].mxu1 %v273_v10 }
 0x160   : > { %v405_v18 = vpop.f32.mrb[0].mxu0 }
 0x161   : > { %v406_v19 = vadd.f32 %v405_v18, %v327_v16  ;;  %v407_v0 = vpop.f32.mrb[1].mxu0 }
 0x162   : > { %v408_v25 = vadd.f32 %v407_v0, %v331_v20 }
 0x163   : > { %v2698_v21 = vmul.f32 0.17677669, %v406_v19 }
 0x164   : > { %v411_v23 = vpop.f32.mrb[2].mxu0 }
 0x165   : > { %v413_v24 = vpop.f32.mrb[3].mxu0  ;;  %1914 = vmatprep.mubr.msk.f32.mxu0 %vm494_vm0, %v2698_v21  ;;  %v412_v32 = vadd.f32 %v411_v23, %v327_v16 }
 0x166   : > { %v414_v26 = vadd.f32 %v413_v24, %v331_v20  ;;  %v1909_v31 = vpop.f32.mrb[0].mxu1 }
 0x167   : > { %v488_v33 = vadd.f32 %v1909_v31, %v335_v28  ;;  %v482_v34 = vpop.f32.mrb[1].mxu1  ;;  %v2716_v37 = vmul.f32 0.17677669, %v412_v32 }
 0x168   : > { %v2708_v29 = vpack.i.bf16 %v414_v26, %v408_v25  ;;  %v2074_v30 = vpack.c.bf16 %v414_v26, %v408_v25  ;;  %v483_v35 = vadd.f32 %v482_v34, %v335_v28 }
 0x16a   : > { %2230 = vrot.lane.b32.xlu1 %v2708_v29, %s2457_s12  ;;  %2076 = vmatprep.subr.msk.bf16.mxu0 %vm2704_vm1, %v2074_v30  ;;  %v2080_v36 = vpack.c.bf16 %v488_v33, %v483_v35  ;;  %v2724_v46 = vpack.i.bf16 %v488_v33, %v483_v35 }
 0x16b   : > { %2079 = vmatpush3.bf16.xpose.msk.msra.mxu0 %vm2704_vm1, %v2074_v30 }
 0x16c   : > { %2081 = vmatprep.subr.bf16.mxu1 %v2080_v36 }
 0x16d   : > { %2083 = vmatpush3.bf16.msra.mxu1 %v2080_v36 }
 0x16e   : > { %690 = vrot.lane.b32.xlu1 %v2698_v21, %s2457_s12 }
 0x172   : > { %1915 = vmatmul.mubr.msk.f32.vlgmr.msra.gmra.mrb[4].mxu0 %vm494_vm0, %v2716_v37  ;;  %2235 = vrot.lane.b32.xlu1 %v2724_v46, %s2457_s12 }
 0x1dc   : > { %v2231_v38 = vpop.permute.xlu1 %2230 }
 0x1dd   : > { %v2233_v39 = vunpack.i.h.bf16 %v2231_v38  ;;  %v2232_v40 = vunpack.i.l.bf16 %v2231_v38 }
 0x1df   : > { %v2084_v41 = vpack.c.bf16 %v2233_v39, %v2232_v40 }
 0x1e0   : > { %v691_v52 = vpop.permute.xlu1 %690 }
 0x1e1   : > { %2086 = vmatprep.subr.msk.bf16.mxu1 %vm2704_vm1, %v2084_v41 }
 0x1e4   : > { %v2236_v54 = vpop.permute.xlu1 %2235 }
 0x1e5   : > { %v2238_v55 = vunpack.i.h.bf16 %v2236_v54  ;;  %v2237_v56 = vunpack.i.l.bf16 %v2236_v54  ;;  %v893_v54 = vld [vmem:[#allocation7 + $0x28] sm:$0xff] }
 0x1e7   : > { %v2090_v58 = vpack.c.bf16 %v2238_v55, %v2237_v56  ;;  %v894_v56 = vld [vmem:[#allocation7 + $0x30] sm:$0xff] }
 0x245   : > { %v1916_v42 = vpop.f32.mrb[4].mxu0 }
 0x246   : > { %v573_v43 = vpop.f32.mrb[5].mxu0  ;;  %v586_v45 = vsel %vm582_vm2, %v1916_v42, -inf }
 0x247   : > { %v583_v44 = vsel %vm582_vm2, %v573_v43, -inf }
 0x248   : > { %584 = vmax.xlane.f32.xlu0 %v583_v44 }
 0x24c   : > { %587 = vmax.xlane.f32.xlu0 %v586_v45 }
 0x262   : > { %692 = vrot.lane.b32.xlu0 %v2716_v37, %s2457_s12 }
 0x2d5   : > { %v585_v47 = vpop.xlane.xlu0 %584 }
 0x2d6   : > { %v589_v48 = vsub.f32 %v573_v43, %v585_v47 }
 0x2d8   : > { %v591_v49 = vmul.f32 1.442695, %v589_v48 }
 0x2d9   : > { %v588_v50 = vpop.xlane.xlu0 %587 }
 0x2da   : > { %2259 = vpow2.f32 %v591_v49  ;;  %v590_v51 = vsub.f32 %v1916_v42, %v588_v50 }
 0x2dc   : > { %v593_v53 = vmul.f32 1.442695, %v590_v51 }
 0x2dd   : > { %v693_v60 = vpop.permute.xlu0 %692 }
 0x2de   : > { %2261 = vpow2.f32 %v593_v53  ;;  %v892_v53 = vld [vmem:[#allocation7 + $0x20] sm:$0xff] }
 0x2df   : > { %v2094_v55 = vpack.c.bf16 %v893_v54, %v892_v53  ;;  %v1793_v54 = vld [vmem:[%s2871_s4] ss:$0 sm:$0xff] }
 0x2e1   : > { %2095 = vmatprep.subr.bf16.mxu0 %v2094_v55 }
 0x2e2   : > { %2097 = vmatpush3.bf16.msra.mxu0 %v2094_v55 }
 0x2e4   : > { %v2728_v57 = vpop.eup %2259 }
 0x2e5   : > { %1921 = vmatprep.mubr.msk.f32.mxu1 %vm582_vm2, %v2728_v57  ;;  %v595_v50 = vsel %vm582_vm2, %v2728_v57, 0.0  ;;  %v686_v57 = vld [vmem:[#allocation7] sm:$0xff] }
 0x2e8   : > { %v2732_v59 = vpop.eup %2261 }
 0x2e9   : > { %1922 = vmatmul.mubr.msk.f32.vlgmr.msra.gmra.mrb[2].mxu1 %vm582_vm2, %v2732_v59  ;;  %v598_v51 = vsel %vm582_vm2, %v2732_v59, 0.0 }
 0x2ea   : > { %2089 = vmatpush3.bf16.xpose.msk.msra.mxu1 %vm2704_vm1, %v2084_v41  ;;  %1928 = vmatprep.mubr.msk.f32.mxu1 %vm494_vm0, %v691_v52 }
 0x2eb   : > { %2091 = vmatprep.subr.bf16.mxu1 %v2090_v58 }
 0x2f1   : > { %1929 = vmatmul.mubr.msk.f32.vlgmr.msra.gmra.mrb[4].mxu1 %vm494_vm0, %v693_v60 }
 0x2f2   : > { %2093 = vmatpush3.bf16.msra.mxu1 %v2090_v58  ;;  %v895_v58 = vld [vmem:[#allocation7 + $0x38] sm:$0xff] }
 0x2f3   : > { %v2098_v60 = vpack.c.bf16 %v895_v58, %v894_v56 }
 0x2f5   : > { %2099 = vmatprep.subr.bf16.mxu0 %v2098_v60 }
 0x2f6   : > { %2101 = vmatpush3.bf16.msra.mxu0 %v2098_v60 }
 0x3bc   : > { %v2740_v61 = vpop.f32.mrb[2].mxu1 }
 0x3bd   : > { %v2742_v62 = vpop.f32.mrb[3].mxu1 }
 0x3c4   : > { %v1930_v63 = vpop.f32.mrb[4].mxu1 }
 0x3c5   : > { %v772_v1 = vpop.f32.mrb[5].mxu1  ;;  %v784_v2 = vsel %vm582_vm2, %v1930_v63, -inf }
 0x3c6   : > { %785 = vmax.xlane.f32.xlu0 %v784_v2  ;;  %v781_v3 = vsel %vm582_vm2, %v772_v1, -inf }
 0x3c7   : > { %782 = vmax.xlane.f32.xlu1 %v781_v3 }
 0x3d8   : > { %1058 = vrot.lane.b32.xlu1 %v2698_v21, %s2458_s13 }
 0x3dc   : > { %2240 = vrot.lane.b32.xlu0 %v2708_v29, %s2458_s13  ;;  %1060 = vrot.lane.b32.xlu1 %v2716_v37, %s2458_s13 }
 0x3e0   : > { %2245 = vrot.lane.b32.xlu1 %v2724_v46, %s2458_s13 }
 0x453   : > { %v786_v4 = vpop.xlane.xlu0 %785 }
 0x454   : > { %v788_v5 = vsub.f32 %v1930_v63, %v786_v4  ;;  %v783_v6 = vpop.xlane.xlu1 %782  ;;  %v687_v63 = vld [vmem:[#allocation7 + $0x8] sm:$0xff] }
 0x455   : > { %v787_v7 = vsub.f32 %v772_v1, %v783_v6  ;;  %v2102_v59 = vpack.c.bf16 %v687_v63, %v686_v57 }
 0x456   : > { %v791_v8 = vmul.f32 1.442695, %v788_v5 }
 0x457   : > { %v789_v9 = vmul.f32 1.442695, %v787_v7  ;;  %v2241_v10 = vpop.permute.xlu0 %2240  ;;  %2103 = vmatprep.subr.bf16.mxu0 %v2102_v59 }
 0x458   : > { %v2243_v11 = vunpack.i.h.bf16 %v2241_v10  ;;  %v2242_v12 = vunpack.i.l.bf16 %v2241_v10  ;;  %v1059_v13 = vpop.permute.xlu1 %1058 }
 0x459   : > { %2263 = vpow2.f32 %v789_v9 }
 0x45a   : > { %2265 = vpow2.f32 %v791_v8  ;;  %v2110_v14 = vpack.c.bf16 %v2243_v11, %v2242_v12 }
 0x45c   : > { %2112 = vmatprep.subr.msk.bf16.mxu1 %vm2704_vm1, %v2110_v14  ;;  %v1061_v15 = vpop.permute.xlu1 %1060 }
 0x460   : > { %v2246_v16 = vpop.permute.xlu1 %2245 }
 0x461   : > { %v2248_v17 = vunpack.i.h.bf16 %v2246_v16  ;;  %v2247_v18 = vunpack.i.l.bf16 %v2246_v16 }
 0x463   : > { %v2264_v19 = vpop.eup %2263  ;;  %v2116_v0 = vpack.c.bf16 %v2248_v17, %v2247_v18 }
 0x464   : > { %v2266_v20 = vpop.eup %2265  ;;  %1935 = vmatprep.mubr.msk.f32.mxu1 %vm582_vm2, %v2264_v19  ;;  %v793_v27 = vsel %vm582_vm2, %v2264_v19, 0.0  ;;  %v688_v19 = vld [vmem:[#allocation7 + $0x10] sm:$0xff] }
 0x465   : > { %1936 = vmatmul.mubr.msk.f32.vlgmr.msra.gmra.mrb[6].mxu1 %vm582_vm2, %v2266_v20  ;;  %v796_v49 = vsel %vm582_vm2, %v2266_v20, 0.0 }
 0x466   : > { %2115 = vmatpush3.bf16.xpose.msk.msra.mxu1 %vm2704_vm1, %v2110_v14  ;;  %1964 = vmatprep.mubr.msk.f32.mxu1 %vm494_vm0, %v1059_v13 }
 0x467   : > { %2117 = vmatprep.subr.bf16.mxu1 %v2116_v0 }
 0x46d   : > { %1965 = vmatmul.mubr.msk.f32.vlgmr.msra.gmra.mrb[8].mxu1 %vm494_vm0, %v1061_v15 }
 0x46e   : > { %2119 = vmatpush3.bf16.msra.mxu1 %v2116_v0  ;;  %v689_v0 = vld [vmem:[#allocation7 + $0x18] sm:$0xff] }
 0x538   : > { %v2758_v22 = vpop.f32.mrb[6].mxu1 }
 0x539   : > { %v2760_v23 = vpop.f32.mrb[7].mxu1 }
 0x540   : > { %v1966_v24 = vpop.f32.mrb[8].mxu1 }
 0x541   : > { %v1140_v25 = vpop.f32.mrb[9].mxu1  ;;  %v1152_v26 = vsel %vm582_vm2, %v1966_v24, -inf }
 0x542   : > { %1153 = vmax.xlane.f32.xlu0 %v1152_v26  ;;  %v1149_v28 = vsel %vm582_vm2, %v1140_v25, -inf }
 0x543   : > { %1150 = vmax.xlane.f32.xlu1 %v1149_v28  ;;  %v2106_v28 = vpack.c.bf16 %v689_v0, %v688_v19 }
 0x554   : > { %1345 = vrot.lane.b32.xlu1 %v2698_v21, %s2459_s10 }
 0x558   : > { %2250 = vrot.lane.b32.xlu0 %v2708_v29, %s2459_s10  ;;  %1347 = vrot.lane.b32.xlu1 %v2716_v37, %s2459_s10 }
 0x5cf   : > { %v1154_v30 = vpop.xlane.xlu0 %1153 }
 0x5d0   : > { %v1156_v31 = vsub.f32 %v1966_v24, %v1154_v30  ;;  %v1151_v32 = vpop.xlane.xlu1 %1150 }
 0x5d1   : > { %v1155_v33 = vsub.f32 %v1140_v25, %v1151_v32  ;;  %v1259_v32 = vld [vmem:[#allocation7 + $0x48] sm:$0xff] }
 0x5d2   : > { %v1159_v34 = vmul.f32 1.442695, %v1156_v31  ;;  %v1258_v31 = vld [vmem:[#allocation7 + $0x40] sm:$0xff] }
 0x5d3   : > { %v1157_v35 = vmul.f32 1.442695, %v1155_v33  ;;  %v2251_v36 = vpop.permute.xlu0 %2250 }
 0x5d4   : > { %v2253_v38 = vunpack.i.h.bf16 %v2251_v36  ;;  %v2252_v39 = vunpack.i.l.bf16 %v2251_v36  ;;  %v1346_v37 = vpop.permute.xlu1 %1345 }
 0x5d5   : > { %2267 = vpow2.f32 %v1157_v35  ;;  %v1260_v35 = vld [vmem:[#allocation7 + $0x50] sm:$0xff] }
 0x5d6   : > { %2269 = vpow2.f32 %v1159_v34  ;;  %v2128_v40 = vpack.c.bf16 %v2253_v38, %v2252_v39  ;;  %v2120_v34 = vpack.c.bf16 %v1259_v32, %v1258_v31 }
 0x5d8   : > { %2130 = vmatprep.subr.msk.bf16.mxu1 %vm2704_vm1, %v2128_v40  ;;  %v1348_v41 = vpop.permute.xlu1 %1347 }
 0x5df   : > { %v2268_v21 = vpop.eup %2267 }
 0x5e0   : > { %v2270_v29 = vpop.eup %2269  ;;  %1971 = vmatprep.mubr.msk.f32.mxu1 %vm582_vm2, %v2268_v21  ;;  %v1161_v52 = vsel %vm582_vm2, %v2268_v21, 0.0 }
 0x5e1   : > { %1972 = vmatmul.mubr.msk.f32.vlgmr.msra.gmra.mrb[10].mxu1 %vm582_vm2, %v2270_v29  ;;  %v1164_v1 = vsel %vm582_vm2, %v2270_v29, 0.0  ;;  %v1546_v29 = vld [vmem:[#allocation7 + $0x68] sm:$0xff] }
 0x5e2   : > { %2133 = vmatpush3.bf16.xpose.msk.msra.mxu1 %vm2704_vm1, %v2128_v40  ;;  %1989 = vmatprep.mubr.msk.f32.mxu1 %vm494_vm0, %v1346_v37 }
 0x5e9   : > { %1990 = vmatmul.mubr.msk.f32.vlgmr.msra.gmra.mrb[12].mxu1 %vm494_vm0, %v1348_v41 }
 0x6b4   : > { %v2778_v42 = vpop.f32.mrb[10].mxu1 }
 0x6b5   : > { %v2780_v43 = vpop.f32.mrb[11].mxu1 }
 0x6bc   : > { %v1991_v44 = vpop.f32.mrb[12].mxu1 }
 0x6bd   : > { %v1427_v45 = vpop.f32.mrb[13].mxu1  ;;  %v1439_v47 = vsel %vm582_vm2, %v1991_v44, -inf }
 0x6be   : > { %1440 = vmax.xlane.f32.xlu0 %v1439_v47  ;;  %v1436_v48 = vsel %vm582_vm2, %v1427_v45, -inf  ;;  %v1548_v47 = vld [vmem:[#allocation7 + $0x78] sm:$0xff] }
 0x6bf   : > { %1437 = vmax.xlane.f32.xlu1 %v1436_v48 }
 0x6c2   : > { %794 = vadd.xlane.f32.xlu0 %v793_v27 }
 0x6c6   : > { %797 = vadd.xlane.f32.xlu0 %v796_v49 }
 0x6ca   : > { %596 = vadd.xlane.f32.xlu0 %v595_v50 }
 0x6ce   : > { %599 = vadd.xlane.f32.xlu0 %v598_v51 }
 0x6d0   : > { %2255 = vrot.lane.b32.xlu1 %v2724_v46, %s2459_s10 }
 0x6d2   : > { %1162 = vadd.xlane.f32.xlu0 %v1161_v52 }
 0x6f4   : > { %1165 = vadd.xlane.f32.xlu1 %v1164_v1 }
 0x74b   : > { %v1441_v46 = vpop.xlane.xlu0 %1440 }
 0x74c   : > { %v1443_v2 = vsub.f32 %v1991_v44, %v1441_v46  ;;  %v1438_v3 = vpop.xlane.xlu1 %1437 }
 0x74d   : > { %v1442_v4 = vsub.f32 %v1427_v45, %v1438_v3  ;;  %v1547_v45 = vld [vmem:[#allocation7 + $0x70] sm:$0xff] }
 0x74e   : > { %v1446_v5 = vmul.f32 1.442695, %v1443_v2 }
 0x74f   : > { %v1444_v6 = vmul.f32 1.442695, %v1442_v4  ;;  %v795_v7 = vpop.xlane.xlu0 %794 }
 0x750   : > { %2271 = vpow2.f32 %v1446_v5  ;;  %v2256_v8 = vpop.permute.xlu1 %2255 }
 0x751   : > { %2273 = vpow2.f32 %v1444_v6  ;;  %v2258_v9 = vunpack.i.h.bf16 %v2256_v8  ;;  %v2257_v10 = vunpack.i.l.bf16 %v2256_v8 }
 0x752   : > { %2275 = vrcp.f32 %v795_v7 }
 0x753   : > { %v2134_v11 = vpack.c.bf16 %v2258_v9, %v2257_v10  ;;  %v798_v12 = vpop.xlane.xlu0 %797 }
 0x754   : > { %2277 = vrcp.f32 %v798_v12 }
 0x755   : > { %2135 = vmatprep.subr.bf16.mxu1 %v2134_v11 }
 0x756   : > { %2137 = vmatpush3.bf16.msra.mxu1 %v2134_v11 }
 0x757   : > { %v597_v13 = vpop.xlane.xlu0 %596 }
 0x758   : > { %2279 = vrcp.f32 %v597_v13 }
 0x75a   : > { %v2272_v14 = vpop.eup %2271 }
 0x75b   : > { %v2274_v15 = vpop.eup %2273  ;;  %v600_v16 = vpop.xlane.xlu0 %599  ;;  %v1451_v30 = vsel %vm582_vm2, %v2272_v14, 0.0 }
 0x75c   : > { %v2276_v17 = vpop.eup %2275  ;;  %2281 = vrcp.f32 %v600_v16  ;;  %1996 = vmatprep.mubr.msk.f32.mxu1 %vm582_vm2, %v2274_v15  ;;  %v1448_v18 = vsel %vm582_vm2, %v2274_v15, 0.0 }
 0x75d   : > { %v890_v20 = vmul.f32 %v2276_v17, %v2760_v23  ;;  %1449 = vadd.xlane.f32.xlu0 %v1448_v18  ;;  %1997 = vmatmul.mubr.msk.f32.vlgmr.msra.gmra.mrb[14].mxu1 %vm582_vm2, %v2272_v14 }
 0x75e   : > { %v2278_v24 = vpop.eup %2277 }
 0x75f   : > { %v891_v25 = vmul.f32 %v2278_v24, %v2758_v22  ;;  %1946 = vmatprep.mubr.msk.f32.mxu0 %vm494_vm0, %v890_v20  ;;  %v1163_v26 = vpop.xlane.xlu0 %1162  ;;  %v1261_v22 = vld [vmem:[#allocation7 + $0x58] sm:$0xff] }
 0x760   : > { %2283 = vrcp.f32 %v1163_v26  ;;  %v2124_v39 = vpack.c.bf16 %v1261_v22, %v1260_v35 }
 0x761   : > { %1947 = vmatmul.mubr.msk.f32.vlgmr.msra.gmra.mrb[6].mxu0 %vm494_vm0, %v891_v25  ;;  %1452 = vadd.xlane.f32.xlu0 %v1451_v30 }
 0x762   : > { %v2280_v33 = vpop.eup %2279  ;;  %2105 = vmatpush3.bf16.msra.mxu0 %v2102_v59 }
 0x763   : > { %2107 = vmatprep.subr.bf16.mxu0 %v2106_v28  ;;  %v684_v23 = vmul.f32 %v2280_v33, %v2742_v62  ;;  %v1545_v62 = vld [vmem:[#allocation7 + $0x60] sm:$0xff] }
 0x764   : > { %v2138_v37 = vpack.c.bf16 %v1546_v29, %v1545_v62 }
 0x765   : > { %1957 = vmatprep.mubr.msk.f32.mxu0 %vm494_vm0, %v684_v23 }
 0x766   : > { %v2282_v36 = vpop.eup %2281  ;;  %2109 = vmatpush3.bf16.msra.mxu0 %v2106_v28 }
 0x767   : > { %v685_v38 = vmul.f32 %v2282_v36, %v2740_v61  ;;  %2121 = vmatprep.subr.bf16.mxu0 %v2120_v34 }
 0x769   : > { %1958 = vmatmul.mubr.msk.f32.vlgmr.msra.gmra.mrb[6].mxu0 %vm494_vm0, %v685_v38 }
 0x76a   : > { %v2284_v40 = vpop.eup %2283  ;;  %2123 = vmatpush3.bf16.msra.mxu0 %v2120_v34 }
 0x76b   : > { %v1256_v21 = vmul.f32 %v2284_v40, %v2780_v43  ;;  %2125 = vmatprep.subr.bf16.mxu0 %v2124_v39  ;;  %v2142_v43 = vpack.c.bf16 %v1548_v47, %v1547_v45 }
 0x76d   : > { %1982 = vmatprep.mubr.msk.f32.mxu0 %vm494_vm0, %v1256_v21 }
 0x76e   : > { %2127 = vmatpush3.bf16.msra.mxu0 %v2124_v39 }
 0x76f   : > { %2139 = vmatprep.subr.bf16.mxu0 %v2138_v37 }
 0x781   : > { %v1166_v41 = vpop.xlane.xlu1 %1165 }
 0x782   : > { %2285 = vrcp.f32 %v1166_v41 }
 0x78c   : > { %v2286_v44 = vpop.eup %2285 }
 0x78d   : > { %v1257_v61 = vmul.f32 %v2286_v44, %v2778_v42 }
 0x78f   : > { %1983 = vmatmul.mubr.msk.f32.vlgmr.msra.gmra.mrb[6].mxu0 %vm494_vm0, %v1257_v61 }
 0x790   : > { %2141 = vmatpush3.bf16.msra.mxu0 %v2138_v37 }
 0x791   : > { %2143 = vmatprep.subr.bf16.mxu0 %v2142_v43 }
 0x794   : > { %2145 = vmatpush3.bf16.msra.mxu0 %v2142_v43 }
 0x7ea   : > { %v1450_v48 = vpop.xlane.xlu0 %1449 }
 0x7eb   : > { %2287 = vrcp.f32 %v1450_v48 }
 0x7ee   : > { %v1453_v27 = vpop.xlane.xlu0 %1452 }
 0x7ef   : > { %2289 = vrcp.f32 %v1453_v27 }
 0x7f5   : > { %v2288_v50 = vpop.eup %2287 }
 0x7f9   : > { %v2290_v52 = vpop.eup %2289 }
 0x830   : > { %v1998_v49 = vpop.f32.mrb[14].mxu1 }
 0x831   : > { %v1532_v51 = vpop.f32.mrb[15].mxu1  ;;  %v1544_v42 = vmul.f32 %v2290_v52, %v1998_v49 }
 0x832   : > { %v1543_v53 = vmul.f32 %v2288_v50, %v1532_v51 }
 0x834   : > { %2007 = vmatprep.mubr.msk.f32.mxu0 %vm494_vm0, %v1543_v53 }
 0x835   : > { %2008 = vmatmul.mubr.msk.f32.vlgmr.msra.gmra.mrb[6].mxu0 %vm494_vm0, %v1544_v42 }
 0x908   : > { %v2009_v55 = vpop.f32.mrb[6].mxu0 }
 0x909   : > { %v1639_v56 = vadd.f32 %v2009_v55, %v1793_v54  ;;  %v1621_v58 = vpop.f32.mrb[7].mxu0 }
 0x90a   : > { %v1638_v60 = vadd.f32 %v1793_v54, %v1621_v58 }
 0x90b   : > { %1641 = vst [vmem:[%s271_s28 + $0x8] sm:$0xff] %v1639_v56 }
 0x90c   : > { %1640 = vst [vmem:[%s271_s28] sm:$0xff] %v1638_v60 }
 0x90d   : > { %2390 = shalt.err (!%p2387_p2)
}
 0x90e   : > { %s2391_s12 = scalar_lea.hbm %s2823_s8, 256  ;;  %s2395_s28 = scalar_lea.hbm %s2872_s5, 512 }
 0x90f   : > { %p2392_p13 = scmp.ne.s32.totalorder %s2823_s8, %s2391_s12  ;;  %p2396_p4 = scmp.lt.u32.totalorder %s2823_s8, %s2872_s5 }
 0x910   : > { %p2397_p7 = scmp.lt.u32.totalorder %s2395_s28, %s2391_s12  ;;  %p2399_p11 = scmp.lt.u32.totalorder %s2391_s12, %s2823_s8 }
 0x911   : > { %p2393_p6 = pnand %p2392_p13, %p2888_p0 }
 0x912   : > { %p2398_p8 = por %p2397_p7, %p2396_p4 }
 0x913   : > { %p2394_p10 = pneg %p2393_p6 }
 0x914   : > { %p2400_p1 = por %p2399_p11, %p2398_p8 }
 0x916   : > { %p2401_p3 = pnand %p2400_p1, %p2394_p10 }
 0x918   : > { %2404 = shalt.err (!%p2401_p3)
}
 0x919   : > { %s2461_s11 = smov 128   ;;  %s2462_s23 = smov 8  }
 0x91a   : > { %2162 = dma.vmem_to_hbm [thread:$0]  (%p2888_p0), %s2818_s15, 256, %s2823_s8, %s1643_s6, %s2461_s11, %s2461_s11, %s2462_s23  }
 0x91b PF: > { %s1671_s7 = sand.u32 1, %s2435_s18   ;;  %p2889_p5 = scmp.ne.s32.totalorder %s2877_s25, 0 }
 0x91c   : > { %p2890_p9 = scmp.ge.s32.totalorder %s2447_s21, 2  ;;  %s1672_s14 = scalar_lea.sflag [#allocation4], %s1671_s7 }
 0x91e   : > { %p2176_p12 = pnand %p2890_p9, %p2889_p5 }
 0x920   : > { %2430 = dma.done.wait (!%p2176_p12), %s1672_s14, 256  }
 0x921   : > { %2432 = vsyncadd (!%p2176_p12), %s1672_s14, 4294967040  ;;  %p19_p2 = scmp.ge.s32.totalorder %s2606_s16, 4   ;;  %s2891_s18 = smov %s2439_s19 }
 0x922   : > { %s2892_s19 = smov %s2443_s20  ;;  %s2893_s20 = smov %s2615_s27 }
 0x923   : > { %s2894_s21 = smov %s2606_s16  ;;  %21 = sbr.rel (!%p19_p2) target bundleno = 6 (0x6), region = 93 }
 0x92a   :  { %1677 = vsyncpa [#allocation3], 1 }
 0x92b   :  { %1679 = vsyncpa [#allocation3 + $0x1], 1 }
 0x92c   :  { %1680 = vsyncpa [#allocation6], 1 }
 0x92d   :  { %1681 = vsyncpa [#allocation4], 1 }
 0x92e   :  { %1683 = vsyncpa [#allocation4 + $0x1], 1 }

</bundles_post_ra>
